<compile_context>
chip_gen: v5e
topology: v5e:2x2
jax: 0.10.0
libtpu: 0.0.40
codegen_flags: <defaults>
</compile_context>

<pallas_src>
import functools

import jax
import jax.numpy as jnp
from jax import lax
from jax.experimental import pallas as pl
from jax.experimental.pallas import tpu as pltpu


_DOT_DIMS = (((1,), (1,)), ((), ()))          # contract K of x (B,K) and W (N,K)

_SINGLE_BLOCK_BUDGET = 24 * 1024 * 1024       # whole problem resident in VMEM
_TILE_BUDGET = 32 * 1024 * 1024               # per-step tile footprint (tiled paths)
_VMEM_CAP = 48 * 1024 * 1024                  # never request more (v7x: 64 MiB/TC)


def _round_up(a, b):
    return ((a + b - 1) // b) * b


def _vmem_limit(footprint_bytes):
    return int(min(_VMEM_CAP, max(footprint_bytes + (8 << 20), 16 << 20)))


def _linear_whole_k_kernel(x_ref, w_ref, b_ref, o_ref, *, precision):
    """Whole K resident: one matmul + bias add, no reduction axis."""
    acc = lax.dot_general(
        x_ref[...], w_ref[...], _DOT_DIMS,
        preferred_element_type=jnp.float32, precision=precision)
    o_ref[...] = (acc + b_ref[...].astype(jnp.float32)).astype(o_ref.dtype)


def _linear_multi_k_kernel(x_ref, w_ref, b_ref, o_ref, *, precision):
    """grid = (Bp//tm, Np//tn, Kp//tk); K innermost ("arbitrary").

    Accumulates directly into the f32 output block (resident across k);
    bias is folded into the k==0 init (no epilogue add, no scratch)."""
    k = pl.program_id(2)

    @pl.when(k == 0)
    def _():
        o_ref[...] = jnp.broadcast_to(
            b_ref[...].astype(o_ref.dtype), o_ref.shape)

    o_ref[...] += lax.dot_general(
        x_ref[...], w_ref[...], _DOT_DIMS,
        preferred_element_type=jnp.float32, precision=precision)


def regression_head(x, weight, bias, *,
                    precision=lax.Precision.DEFAULT,
                    max_tk=None,
                    force_path=None,
                    single_block_budget_bytes=_SINGLE_BLOCK_BUDGET,
                    tile_budget_bytes=_TILE_BUDGET):
    """y = x @ weight.T + bias   (PyTorch nn.Linear semantics, f32 output).

    x:      (..., K)
    weight: (N, K)   PyTorch Linear layout (unpadded, untransposed)
    bias:   (N,)
    precision: lax.Precision.DEFAULT (fast bf16 MXU pass, f32 accumulate) or
               lax.Precision.HIGHEST (exact-f32, matches the PyTorch module).
    force_path: None | "single" | "rows" | "general"  (testing/debug knob)
    """
    lead_shape = x.shape[:-1]
    K = x.shape[-1]
    N, K2 = weight.shape
    assert K == K2, "feature dim mismatch"

    x2 = x.reshape(-1, K)
    B = x2.shape[0]
    b2 = bias.reshape(1, N)
    out_dtype = jnp.float32
    xi = jnp.dtype(x2.dtype).itemsize
    wi = jnp.dtype(weight.dtype).itemsize

    kern_whole = functools.partial(_linear_whole_k_kernel, precision=precision)

    # ----------------------------------------------------------------- path 1
    # Whole problem resident in VMEM: single block, grid=(1,), ZERO padding
    # (full-array block shapes are exempt from the (8,128) divisibility rule).
    single_bytes = 2 * (B * K * xi + N * K * wi + N * wi) + 2 * B * N * 4
    if force_path == "single" or (
            force_path is None and single_bytes <= single_block_budget_bytes):
        out = pl.pallas_call(
            kern_whole,
            out_shape=jax.ShapeDtypeStruct((B, N), out_dtype),
            grid_spec=pltpu.PrefetchScalarGridSpec(
                num_scalar_prefetch=0,
                grid=(1,),
                in_specs=[
                    pl.BlockSpec((B, K), lambda i: (0, 0)),   # x   (whole)
                    pl.BlockSpec((N, K), lambda i: (0, 0)),   # W   (whole, (N,K))
                    pl.BlockSpec((1, N), lambda i: (0, 0)),   # bias
                ],
                out_specs=pl.BlockSpec((B, N), lambda i: (0, 0)),
            ),
            compiler_params=pltpu.CompilerParams(
                dimension_semantics=("arbitrary",),
                vmem_limit_bytes=_vmem_limit(single_bytes)),
        )(x2, weight, b2)
        return out.reshape(lead_shape + (N,))

    # ----------------------------------------------------------------- path 2
    # Large B, but the whole UNPADDED (N,K) weight + bias + one (tm,K) x tile
    # fit in VMEM: stream x row-tiles against a resident weight (constant block
    # index -> the weight is DMA'd from HBM exactly once).
    w_fixed = 2 * N * K * wi + 2 * N * wi + (64 << 10)
    per_row = 2 * K * xi + 2 * N * 4
    tm_cap = (tile_budget_bytes - w_fixed) // per_row
    use_rows = tm_cap >= 8
    if force_path == "rows" or (force_path is None and use_rows):
        assert use_rows, "row path forced but weight does not fit the VMEM budget"
        tm = int(min(512, (tm_cap // 8) * 8, _round_up(B, 8)))
        Bp = _round_up(B, tm)
        xp = x2 if Bp == B else jnp.pad(x2, ((0, Bp - B), (0, 0)))
        footprint = w_fixed + tm * per_row
        out = pl.pallas_call(
            kern_whole,
            out_shape=jax.ShapeDtypeStruct((Bp, N), out_dtype),
            grid_spec=pltpu.PrefetchScalarGridSpec(
                num_scalar_prefetch=0,
                grid=(Bp // tm,),
                in_specs=[
                    pl.BlockSpec((tm, K), lambda i: (i, 0)),   # x row-tile
                    pl.BlockSpec((N, K), lambda i: (0, 0)),    # W resident
                    pl.BlockSpec((1, N), lambda i: (0, 0)),    # bias resident
                ],
                out_specs=pl.BlockSpec((tm, N), lambda i: (i, 0)),
            ),
            compiler_params=pltpu.CompilerParams(
                dimension_semantics=("parallel",),
                vmem_limit_bytes=_vmem_limit(footprint)),
        )(xp, weight, b2)
        if Bp != B:
            out = out[:B]
        return out.reshape(lead_shape + (N,))

    # ----------------------------------------------------------------- path 3
    # General fallback (weight too large to keep resident): 3-D grid with a
    # K-reduction axis.  Padding to tile multiples is only paid on this
    # non-canonical path.
    # TODO(synk): for repeated calls, cache the padded weight/bias alongside
    # the parameters instead of padding per call.
    # TODO(synk): on v7x a degenerate (1,1,Kk) grid could split K across the
    # two TensorCores with one small partial-sum add.
    tm = int(min(512, _round_up(B, 8)))
    tn = int(min(512, _round_up(N, 128)))
    fixed = 2 * tm * tn * 4 + 2 * tn * wi + (64 << 10)
    tk_cap = (tile_budget_bytes - fixed) // (2 * (xi * tm + wi * tn))
    tk = max(128, (int(tk_cap) // 128) * 128)
    if max_tk is not None:
        tk = min(tk, max(128, (max_tk // 128) * 128))
    tk = min(tk, _round_up(K, 128))

    Bp, Np, Kp = _round_up(B, tm), _round_up(N, tn), _round_up(K, tk)
    xp = x2 if (Bp == B and Kp == K) else jnp.pad(x2, ((0, Bp - B), (0, Kp - K)))
    wp = weight if (Np == N and Kp == K) else jnp.pad(
        weight, ((0, Np - N), (0, Kp - K)))
    bp = b2 if Np == N else jnp.pad(b2, ((0, 0), (0, Np - N)))

    footprint = fixed + 2 * tk * (xi * tm + wi * tn)
    kern_multi = functools.partial(_linear_multi_k_kernel, precision=precision)
    out = pl.pallas_call(
        kern_multi,
        out_shape=jax.ShapeDtypeStruct((Bp, Np), out_dtype),
        grid_spec=pltpu.PrefetchScalarGridSpec(
            num_scalar_prefetch=0,
            grid=(Bp // tm, Np // tn, Kp // tk),
            in_specs=[
                pl.BlockSpec((tm, tk), lambda i, j, k: (i, k)),   # x tile
                pl.BlockSpec((tn, tk), lambda i, j, k: (j, k)),   # W tile (N,K)
                pl.BlockSpec((1, tn), lambda i, j, k: (0, j)),    # bias tile
            ],
            out_specs=pl.BlockSpec((tm, tn), lambda i, j, k: (i, j)),
        ),
        compiler_params=pltpu.CompilerParams(
            dimension_semantics=("parallel", "parallel", "arbitrary"),
            vmem_limit_bytes=_vmem_limit(footprint)),
    )(xp, wp, bp)
    if Bp != B or Np != N:
        out = out[:B, :N]
    return out.reshape(lead_shape + (N,))


def init_regression_head(key, n_outputs, n_inputs):
    """Deterministic init mirroring the PyTorch module:
    kaiming_normal_ on weight (std = sqrt(2 / fan_in)), bias = 0."""
    std = jnp.sqrt(2.0 / n_inputs)
    weight = jax.random.normal(key, (n_outputs, n_inputs), dtype=jnp.float32) * std
    bias = jnp.zeros((n_outputs,), dtype=jnp.float32)
    return weight, bias


if __name__ == "__main__":
    # Small shapes consistent with the module: module default n_inputs=2048,
    # a pose-regression sized head (n_outputs=7), small batch.
    B, n_inputs, n_outputs = 4, 2048, 7

    key = jax.random.PRNGKey(0)
    kx, kw, kb = jax.random.split(key, 3)

    x = jax.random.normal(kx, (B, n_inputs), dtype=jnp.float32)
    weight, bias = init_regression_head(kw, n_outputs, n_inputs)
    # Non-zero bias so the bias path is actually exercised.
    bias = 0.1 * jax.random.normal(kb, (n_outputs,), dtype=jnp.float32)

    y_ref = jnp.dot(x, weight.T, precision=lax.Precision.HIGHEST) + bias

    # Path 1 (canonical small head: unpadded single-block), fast DEFAULT precision.
    y = regression_head(x, weight, bias)
    jax.block_until_ready(y)
    assert y.shape == (B, n_outputs)
    assert jnp.allclose(y, y_ref, atol=3e-2, rtol=3e-2), \
        float(jnp.max(jnp.abs(y - y_ref)))

    # Path 1, exact-f32 mode (PyTorch-parity precision).
    y_hi = regression_head(x, weight, bias, precision=lax.Precision.HIGHEST)
    jax.block_until_ready(y_hi)
    assert jnp.allclose(y_hi, y_ref, atol=1e-4, rtol=1e-4), \
        float(jnp.max(jnp.abs(y_hi - y_ref)))

    # Path 2 (x row-tiles streamed against a resident unpadded weight), forced.
    y_rows = regression_head(x, weight, bias, force_path="rows")
    jax.block_until_ready(y_rows)
    assert jnp.allclose(y_rows, y_ref, atol=3e-2, rtol=3e-2), \
        float(jnp.max(jnp.abs(y_rows - y_ref)))

    # Path 3 (general tiled fallback, multi-step K reduction into o_ref), forced.
    y_gen = regression_head(x, weight, bias, force_path="general", max_tk=512)
    jax.block_until_ready(y_gen)
    assert jnp.allclose(y_gen, y_ref, atol=3e-2, rtol=3e-2), \
        float(jnp.max(jnp.abs(y_gen - y_ref)))

    print("KERNEL_OK")
</pallas_src>

<mosaic_0001>
module attributes {stable_mosaic.version = 11 : i64} {
  func.func @_linear_whole_k_kernel(%arg0: i32, %arg1: memref<4x2048xf32, #tpu.memory_space<vmem>>, %arg2: memref<7x2048xf32, #tpu.memory_space<vmem>>, %arg3: memref<1x7xf32, #tpu.memory_space<vmem>>, %arg4: memref<4x7xf32, #tpu.memory_space<vmem>>) attributes {dimension_semantics = [#tpu.dimension_semantics<arbitrary>], iteration_bounds = array<i64: 1>, scalar_prefetch = 0 : i64, scratch_operands = 0 : i64, tpu.core_type = #tpu.core_type<tc>, window_params = [{pipeline_mode = #tpu.pipeline_mode<synchronous>, transform_indices = @transform_0, window_bounds = array<i64: 4, 2048>}, {pipeline_mode = #tpu.pipeline_mode<synchronous>, transform_indices = @transform_1, window_bounds = array<i64: 7, 2048>}, {pipeline_mode = #tpu.pipeline_mode<synchronous>, transform_indices = @transform_2, window_bounds = array<i64: 1, 7>}, {pipeline_mode = #tpu.pipeline_mode<synchronous>, transform_indices = @transform_3, window_bounds = array<i64: 4, 7>}]} {
    %c0 = arith.constant 0 : index
    %c0_0 = arith.constant 0 : index
    %0 = vector.load %arg1[%c0, %c0_0] : memref<4x2048xf32, #tpu.memory_space<vmem>>, vector<4x2048xf32>
    %c0_1 = arith.constant 0 : index
    %c0_2 = arith.constant 0 : index
    %1 = vector.load %arg2[%c0_1, %c0_2] : memref<7x2048xf32, #tpu.memory_space<vmem>>, vector<7x2048xf32>
    %cst = arith.constant dense<0.000000e+00> : vector<4x7xf32>
    %2 = tpu.matmul %0, %1, %cst {dimension_numbers = #tpu.dot_dimension_numbers<[1], [1], [0], [0], [0, 0, 1, 0], [], []>} : vector<4x2048xf32>, vector<7x2048xf32>, vector<4x7xf32> -> vector<4x7xf32>
    %c0_3 = arith.constant 0 : index
    %c0_4 = arith.constant 0 : index
    %3 = vector.load %arg3[%c0_3, %c0_4] : memref<1x7xf32, #tpu.memory_space<vmem>>, vector<1x7xf32>
    %4 = vector.broadcast %3 : vector<1x7xf32> to vector<4x7xf32>
    %5 = arith.addf %2, %4 : vector<4x7xf32>
    %c0_5 = arith.constant 0 : index
    %c0_6 = arith.constant 0 : index
    %6 = vector.load %arg4[%c0_5, %c0_6] : memref<4x7xf32, #tpu.memory_space<vmem>>, vector<4x7xf32>
    tpu.vector_store %arg4[%c0_5, %c0_6], %5 {strides = array<i32>} : memref<4x7xf32, #tpu.memory_space<vmem>>, vector<4x7xf32>,
    return
  }
  func.func @transform_0(%arg0: i32) -> (i32, i32) {
    %c0_i32 = arith.constant 0 : i32
    %c0_i32_0 = arith.constant 0 : i32
    %c0_i32_1 = arith.constant 0 : i32
    return %c0_i32, %c0_i32_0 : i32, i32
  }
  func.func @transform_1(%arg0: i32) -> (i32, i32) {
    %c0_i32 = arith.constant 0 : i32
    %c0_i32_0 = arith.constant 0 : i32
    %c0_i32_1 = arith.constant 0 : i32
    return %c0_i32, %c0_i32_0 : i32, i32
  }
  func.func @transform_2(%arg0: i32) -> (i32, i32) {
    %c0_i32 = arith.constant 0 : i32
    %c0_i32_0 = arith.constant 0 : i32
    %c0_i32_1 = arith.constant 0 : i32
    return %c0_i32, %c0_i32_0 : i32, i32
  }
  func.func @transform_3(%arg0: i32) -> (i32, i32) {
    %c0_i32 = arith.constant 0 : i32
    %c0_i32_0 = arith.constant 0 : i32
    %c0_i32_1 = arith.constant 0 : i32
    return %c0_i32, %c0_i32_0 : i32, i32
  }
}

</mosaic_0001>

<bundles_post_ra>
// kernel: tpu_custom_call.1
= control target key start
LH: loop header
LB: loop body
LE: loop exit
PB: predicated region body
PF: predicated region fallthrough
CT: control target
= control target key end

     0   :  { %8 = vsyncpa [#allocation3], 0  ;;  %s579_s0 = inlined_call_operand.hbm [shape: f32[4,2048], index: 0, kind: input, shape index: {}]   ;;  %s580_s1 = inlined_call_operand.hbm [shape: f32[7,2048], index: 1, kind: input, shape index: {}]   ;;  %s581_s2 = inlined_call_operand.vmem [shape: f32[1,7], index: 2, kind: input, shape index: {}]   ;;  %s582_s3 = inlined_call_operand.hbm [shape: f32[4,7], index: 3, kind: output, shape index: {}]  }
   0x1   :  { %9 = vsyncpa [#allocation6], 0 }
   0x2   :  { %10 = vsyncpa [#allocation4], 0  ;;  %s16_s14 = sshll.u32 %s579_s0, 4  ;;  %s544_s15 = smov [#allocation2]   ;;  %s17_s14 = int_to_ptr.hbm [resolvable:$true] %s16_s14 }
   0x3   :  { %s18_s16 = sshll.u32 %s544_s15, 4  ;;  %s27_s19 = sshll.u32 %s580_s1, 4  ;;  %s19_s16 = int_to_ptr.vmem [resolvable:$true] %s18_s16  ;;  %s28_s19 = int_to_ptr.hbm [resolvable:$true] %s27_s19 }
   0x4   :  { %21 = dma.hbm_to_vmem [thread:$0]  %s17_s14, 1024, %s19_s16, [#allocation3]  }
   0x5   :  { %s545_s20 = smov [#allocation5]  }
   0x6   :  { %s29_s21 = sshll.u32 %s545_s20, 4  ;;  %s30_s21 = int_to_ptr.vmem [resolvable:$true] %s29_s21 }
   0x7   :  { %32 = dma.hbm_to_vmem [thread:$0]  %s28_s19, 2048, %s30_s21, [#allocation6]  }
   0x8   :  { %538 = dma.done.wait [#allocation3], 1024  }
   0x9   :  { %539 = vsyncadd [#allocation3], 4294966272 }
   0xa   :  { %540 = dma.done.wait [#allocation6], 2048  }
   0xb   :  { %541 = vsyncadd [#allocation6], 4294965248  ;;  %v53_v0 = vld [vmem:[#allocation5 + $0x10] sm:$0x7f]  ;;  %v51_v1 = vld [vmem:[#allocation5] sm:$0x7f] }
   0xc   :  { %v54_v2 = vld [vmem:[#allocation5 + $0x18] sm:$0x7f]  ;;  %177 = vmatpush.xpose.msra.mxu2 %v53_v0  ;;  %137 = vmatpush.xpose.msra.mxu0 %v51_v1  ;;  %v44_v3 = vld [vmem:[#allocation2 + $0x8] sm:$0xff]  ;;  %v57_v4 = vld [vmem:[#allocation5 + $0x30] sm:$0x7f]  ;;  %s451_s25 = sshll.u32 %s582_s3, 4  ;;  %s452_s25 = int_to_ptr.hbm [resolvable:$true] %s451_s25 }
   0xd   :  { %v52_v5 = vld [vmem:[#allocation5 + $0x8] sm:$0x7f]  ;;  %197 = vmatpush.xpose.msra.mxu3 %v54_v2  ;;  %81 = vst [vmem:[#allocation1 + $0x10] ss:$2 sm:$0xff] %v44_v3  ;;  %v43_v6 = vld [vmem:[#allocation2] sm:$0xff]  ;;  %v46_v9 = vld [vmem:[#allocation2 + $0x18] sm:$0xff] }
   0xe   :  { %v55_v7 = vld [vmem:[#allocation5 + $0x20] sm:$0x7f]  ;;  %157 = vmatpush.xpose.msra.mxu1 %v52_v5  ;;  %79 = vst [vmem:[#allocation1] ss:$2 sm:$0xff] %v43_v6  ;;  %v58_v8 = vld [vmem:[#allocation5 + $0x38] sm:$0x7f] }
   0xf   :  { %v56_v10 = vld [vmem:[#allocation5 + $0x28] sm:$0x7f]  ;;  %85 = vst [vmem:[#allocation1 + $0x30] ss:$2 sm:$0xff] %v46_v9  ;;  %v45_v11 = vld [vmem:[#allocation2 + $0x10] sm:$0xff]  ;;  %v47_v13 = vld [vmem:[#allocation2 + $0x20] sm:$0xff] }
  0x10   :  { %257 = vmatpush.xpose.msrb.mxu2 %v57_v4  ;;  %217 = vmatpush.xpose.msrb.mxu0 %v55_v7  ;;  %v48_v12 = vld [vmem:[#allocation2 + $0x28] sm:$0xff]  ;;  %83 = vst [vmem:[#allocation1 + $0x20] ss:$2 sm:$0xff] %v45_v11  ;;  %v61_v14 = vld [vmem:[#allocation5 + $0x50] sm:$0x7f]  ;;  %v50_v21 = vld [vmem:[#allocation2 + $0x38] sm:$0xff] }
  0x11   :  { %277 = vmatpush.xpose.msrb.mxu3 %v58_v8  ;;  %v59_v15 = vld [vmem:[#allocation5 + $0x40] sm:$0x7f]  ;;  %v62_v16 = vld [vmem:[#allocation5 + $0x58] sm:$0x7f]  ;;  %v60_v17 = vld [vmem:[#allocation5 + $0x48] sm:$0x7f] }
  0x12   :  { %237 = vmatpush.xpose.msrb.mxu1 %v56_v10  ;;  %v49_v25 = vld [vmem:[#allocation2 + $0x30] sm:$0xff]  ;;  %v63_v29 = vld [vmem:[#allocation5 + $0x60] sm:$0x7f]  ;;  %v66_v30 = vld [vmem:[#allocation5 + $0x78] sm:$0x7f]  ;;  %vm442_vm0 = vcmask 52224  }
  0x13   :  { %v65_v28 = vld [vmem:[#allocation5 + $0x70] sm:$0x7f]  ;;  %v64_v31 = vld [vmem:[#allocation5 + $0x68] sm:$0x7f]  ;;  %v465_v40 = vld [vmem:[%s581_s2] ss:$0 sm:$0xff] }
  0x14   :  { %v88_v18 = vld.sshfl [vmem:[#allocation1 + $0x10] sm:$0xff pattern:$0x75316420]  ;;  %v89_v19 = vld.sshfl [vmem:[#allocation1 + $0x18] sm:$0xff pattern:$0x75316420] }
  0x15   :  { %178 = vmatmul.f32.vlgmr.msra.gmra.mxu2 %v88_v18  ;;  %v86_v20 = vld.sshfl [vmem:[#allocation1] sm:$0xff pattern:$0x75316420]  ;;  %95 = vst [vmem:[#allocation1 + $0x10] ss:$2 sm:$0xff] %v48_v12  ;;  %198 = vmatmul.f32.vlgmr.msra.gmra.mxu3 %v89_v19  ;;  %s546_s2 = smov [#allocation7]  }
  0x16   :  { %138 = vmatmul.f32.vlgmr.msra.gmra.mxu0 %v86_v20  ;;  %v87_v22 = vld.sshfl [vmem:[#allocation1 + $0x8] sm:$0xff pattern:$0x75316420]  ;;  %v92_v23 = vld.sshfl [vmem:[#allocation1 + $0x30] sm:$0xff pattern:$0x75316420]  ;;  %337 = vmatpush.xpose.msra.mxu2 %v61_v14 }
  0x17   :  { %94 = vst [vmem:[#allocation1] ss:$2 sm:$0xff] %v47_v13  ;;  %158 = vmatmul.f32.vlgmr.msra.gmra.mxu1 %v87_v22  ;;  %v93_v24 = vld.sshfl [vmem:[#allocation1 + $0x38] sm:$0xff pattern:$0x75316420]  ;;  %297 = vmatpush.xpose.msra.mxu0 %v59_v15  ;;  %s449_s22 = sshll.u32 %s546_s2, 4  ;;  %s450_s22 = int_to_ptr.vmem [resolvable:$true] %s449_s22 }
  0x18   :  { %97 = vst [vmem:[#allocation1 + $0x30] ss:$2 sm:$0xff] %v50_v21  ;;  %357 = vmatpush.xpose.msra.mxu3 %v62_v16  ;;  %317 = vmatpush.xpose.msra.mxu1 %v60_v17  ;;  %v90_v26 = vld.sshfl [vmem:[#allocation1 + $0x20] sm:$0xff pattern:$0x75316420] }
  0x19   :  { %v91_v27 = vld.sshfl [vmem:[#allocation1 + $0x28] sm:$0xff pattern:$0x75316420] }
  0x1a   :  { %96 = vst [vmem:[#allocation1 + $0x20] ss:$2 sm:$0xff] %v49_v25 }
  0x1c   :  { %v100_v32 = vld.sshfl [vmem:[#allocation1 + $0x10] sm:$0xff pattern:$0x75316420]  ;;  %v101_v33 = vld.sshfl [vmem:[#allocation1 + $0x18] sm:$0xff pattern:$0x75316420] }
  0x1d   :  { %258 = vmatmul.f32.vlgmr.msrb.gmra.mxu2 %v92_v23  ;;  %278 = vmatmul.f32.vlgmr.msrb.gmra.mxu3 %v93_v24 }
  0x1e   :  { %218 = vmatmul.f32.vlgmr.msrb.gmra.mxu0 %v90_v26  ;;  %417 = vmatpush.xpose.msrb.mxu2 %v65_v28  ;;  %v98_v34 = vld.sshfl [vmem:[#allocation1] sm:$0xff pattern:$0x75316420]  ;;  %v99_v35 = vld.sshfl [vmem:[#allocation1 + $0x8] sm:$0xff pattern:$0x75316420] }
  0x1f   :  { %238 = vmatmul.f32.vlgmr.msrb.gmra.mxu1 %v91_v27  ;;  %377 = vmatpush.xpose.msrb.mxu0 %v63_v29  ;;  %v104_v36 = vld.sshfl [vmem:[#allocation1 + $0x30] sm:$0xff pattern:$0x75316420]  ;;  %v105_v37 = vld.sshfl [vmem:[#allocation1 + $0x38] sm:$0xff pattern:$0x75316420] }
  0x20   :  { %437 = vmatpush.xpose.msrb.mxu3 %v66_v30  ;;  %397 = vmatpush.xpose.msrb.mxu1 %v64_v31 }
  0x21   :  { %v102_v38 = vld.sshfl [vmem:[#allocation1 + $0x20] sm:$0xff pattern:$0x75316420]  ;;  %v103_v39 = vld.sshfl [vmem:[#allocation1 + $0x28] sm:$0xff pattern:$0x75316420] }
  0x25   :  { %338 = vmatmul.f32.vlgmr.msra.gmra.mxu2 %v100_v32  ;;  %358 = vmatmul.f32.vlgmr.msra.gmra.mxu3 %v101_v33 }
  0x26   :  { %298 = vmatmul.f32.vlgmr.msra.gmra.mxu0 %v98_v34 }
  0x27   :  { %318 = vmatmul.f32.vlgmr.msra.gmra.mxu1 %v99_v35 }
  0x2d   :  { %418 = vmatmul.f32.vlgmr.msrb.gmra.mxu2 %v104_v36  ;;  %438 = vmatmul.f32.vlgmr.msrb.gmra.mxu3 %v105_v37 }
  0x2e   :  { %378 = vmatmul.f32.vlgmr.msrb.gmra.mxu0 %v102_v38 }
  0x2f   :  { %398 = vmatmul.f32.vlgmr.msrb.gmra.mxu1 %v103_v39 }
  0x93   :  { %v139_v41 = vpop.f32.mrf.mxu0 }
  0x94   :  { %v140_v42 = vadd.f32 %v465_v40, %v139_v41  ;;  %v159_v43 = vpop.f32.mrf.mxu1 }
  0x96   :  { %v160_v44 = vadd.f32 %v159_v43, %v140_v42 }
  0x98   :  { %v179_v45 = vpop.f32.mrf.mxu2  ;;  %v199_v46 = vpop.f32.mrf.mxu3 }
  0x99   :  { %v180_v47 = vadd.f32 %v179_v45, %v160_v44 }
  0x9b   :  { %v200_v48 = vadd.f32 %v199_v46, %v180_v47  ;;  %v219_v49 = vpop.f32.mrf.mxu0 }
  0x9c   :  { %v239_v50 = vpop.f32.mrf.mxu1 }
  0x9d   :  { %v220_v51 = vadd.f32 %v219_v49, %v200_v48 }
  0x9f   :  { %v240_v52 = vadd.f32 %v239_v50, %v220_v51 }
  0xa0   :  { %v259_v53 = vpop.f32.mrf.mxu2  ;;  %v279_v54 = vpop.f32.mrf.mxu3 }
  0xa1   :  { %v260_v55 = vadd.f32 %v259_v53, %v240_v52 }
  0xa3   :  { %v280_v56 = vadd.f32 %v279_v54, %v260_v55  ;;  %v299_v57 = vpop.f32.mrf.mxu0 }
  0xa4   :  { %v319_v58 = vpop.f32.mrf.mxu1 }
  0xa5   :  { %v300_v59 = vadd.f32 %v299_v57, %v280_v56 }
  0xa7   :  { %v320_v60 = vadd.f32 %v319_v58, %v300_v59 }
  0xa8   :  { %v339_v61 = vpop.f32.mrf.mxu2  ;;  %v359_v62 = vpop.f32.mrf.mxu3 }
  0xa9   :  { %v340_v63 = vadd.f32 %v339_v61, %v320_v60 }
  0xab   :  { %v360_v0 = vadd.f32 %v359_v62, %v340_v63  ;;  %v379_v1 = vpop.f32.mrf.mxu0 }
  0xac   :  { %v399_v2 = vpop.f32.mrf.mxu1 }
  0xad   :  { %v380_v3 = vadd.f32 %v379_v1, %v360_v0 }
  0xaf   :  { %v400_v4 = vadd.f32 %v399_v2, %v380_v3 }
  0xb0   :  { %v419_v5 = vpop.f32.mrf.mxu2  ;;  %v439_v6 = vpop.f32.mrf.mxu3 }
  0xb1   :  { %v420_v7 = vadd.f32 %v419_v5, %v400_v4 }
  0xb3   :  { %v440_v8 = vadd.f32 %v439_v6, %v420_v7 }
  0xb5   :  { %443 = vst.msk [vmem:[#allocation7] sm:$0xf] %vm442_vm0, %v440_v8 }
  0xb6   :  { %454 = dma.vmem_to_hbm [thread:$0]  %s450_s22, 64, %s452_s25, [#allocation4]  }
  0xb7   :  { %542 = dma.done.wait [#allocation4], 64  }
  0xb8   :  { %543 = vsyncadd [#allocation4], 4294967232 }
  0xb9   :  { %459 = vsyncpa [#allocation3], 1 }
  0xba   :  { %460 = vsyncpa [#allocation6], 1 }
  0xbb   :  { %461 = vsyncpa [#allocation4], 1 }

</bundles_post_ra>
